<compile_context>
chip_gen: v7x
topology: tpu7x:2x2x1
jax: 0.10.0
libtpu: 0.0.40
codegen_flags: <defaults>
</compile_context>

<pallas_src>
import numpy as np

import jax
import jax.numpy as jnp
from jax.experimental import pallas as pl
from jax.experimental.pallas import tpu as pltpu


_F32_EPS = float(np.finfo(np.float32).eps)      # torch.finfo(torch.float32).eps
_INV_LN10 = float(1.0 / np.log(10.0))


def _round_up(x, m):
    return ((x + m - 1) // m) * m


# ---------------------------------------------------------------------------
# Deterministic constant construction (mirrors LFCC.__init__)
# ---------------------------------------------------------------------------
def _trimf(x, a, b, c):
    y = np.zeros_like(x)
    if a < b:
        idx = np.logical_and(a < x, x < b)
        y[idx] = (x[idx] - a) / (b - a)
    if b < c:
        idx = np.logical_and(b < x, x < c)
        y[idx] = (c - x[idx]) / (c - b)
    y[x == b] = 1.0
    return y


def _hamming_padded(fl, fn):
    # torch.hamming_window(fl) (periodic) centred inside an fn-long frame,
    # exactly as torch.stft does when win_length < n_fft.
    win = 0.54 - 0.46 * np.cos(2.0 * np.pi * np.arange(fl) / fl)
    left = (fn - fl) // 2
    wp = np.zeros(fn, dtype=np.float64)
    wp[left:left + fl] = win
    return wp


def _filter_bank(fn, sr, filter_num):
    nbins = fn // 2 + 1
    f = sr / 2.0 * np.linspace(0.0, 1.0, nbins)
    bands = np.linspace(f.min(), f.max(), filter_num + 2)
    fb = np.zeros((nbins, filter_num), dtype=np.float64)
    for i in range(filter_num):
        fb[:, i] = _trimf(f, bands[i], bands[i + 1], bands[i + 2])
    return fb


def _dct_matrix(n):
    # DCT-II with 'ortho' norm, applied as x @ D (matches nii_dsp.LinearDCT).
    nn_ = np.arange(n)[:, None]
    kk = np.arange(n)[None, :]
    d = np.cos(np.pi * (2.0 * nn_ + 1.0) * kk / (2.0 * n))
    d[:, 0] *= 1.0 / np.sqrt(n)
    d[:, 1:] *= np.sqrt(2.0 / n)
    return d


def _build_padded_constants(fl, fn, sr, filter_num, flag_for_LFB):
    nbins = fn // 2 + 1
    fn_p = _round_up(fn, 128)
    nb_p = _round_up(nbins, 128)
    f_p = _round_up(filter_num, 128)

    wp = _hamming_padded(fl, fn)                       # (fn,)
    n = np.arange(fn)[:, None]
    k = np.arange(nbins)[None, :]
    ang = 2.0 * np.pi * n * k / fn
    cw = wp[:, None] * np.cos(ang)                     # window folded into DFT
    sw = -wp[:, None] * np.sin(ang)

    fbank = _filter_bank(fn, sr, filter_num)           # (nbins, filter_num)
    dct = np.eye(filter_num) if flag_for_LFB else _dct_matrix(filter_num)

    def pad2(a, r, c):
        out = np.zeros((r, c), dtype=np.float32)
        out[:a.shape[0], :a.shape[1]] = a
        return out

    consts = (pad2(cw, fn_p, nb_p), pad2(sw, fn_p, nb_p),
              pad2(fbank, nb_p, f_p), pad2(dct, f_p, f_p))
    dims = dict(nbins=nbins, fn_p=fn_p, nb_p=nb_p, f_p=f_p)
    return consts, dims


# ---------------------------------------------------------------------------
# Pallas kernel: frames -> power spectrum -> filter bank -> log10 -> DCT
# All four contractions go to the MXU; tiles are lane-dense (128-padded).
# ---------------------------------------------------------------------------
def _lfcc_kernel(fr_ref, cw_ref, sw_ref, fb_ref, dct_ref, out_ref):
    fr = fr_ref[...]                                               # (Rt, FN_P)
    re = jnp.dot(fr, cw_ref[...], preferred_element_type=jnp.float32)
    im = jnp.dot(fr, sw_ref[...], preferred_element_type=jnp.float32)
    power = re * re + im * im                                      # (Rt, NB_P)
    fb = jnp.dot(power, fb_ref[...], preferred_element_type=jnp.float32)
    logfb = jnp.log(fb + _F32_EPS) * _INV_LN10                     # log10
    out_ref[...] = jnp.dot(logfb, dct_ref[...],
                           preferred_element_type=jnp.float32)


def _lfcc_pallas(frames2d, cw, sw, fbank, dct, row_tile):
    rows, fn_p = frames2d.shape
    nb_p = cw.shape[1]
    f_p = dct.shape[1]
    grid = (rows // row_tile,)
    return pl.pallas_call(
        _lfcc_kernel,
        out_shape=jax.ShapeDtypeStruct((rows, f_p), jnp.float32),
        grid_spec=pltpu.PrefetchScalarGridSpec(
            num_scalar_prefetch=0,
            grid=grid,
            in_specs=[
                pl.BlockSpec((row_tile, fn_p), lambda r: (r, 0)),
                pl.BlockSpec((fn_p, nb_p), lambda r: (0, 0)),
                pl.BlockSpec((fn_p, nb_p), lambda r: (0, 0)),
                pl.BlockSpec((nb_p, f_p), lambda r: (0, 0)),
                pl.BlockSpec((f_p, f_p), lambda r: (0, 0)),
            ],
            out_specs=pl.BlockSpec((row_tile, f_p), lambda r: (r, 0)),
        ),
        compiler_params=pltpu.CompilerParams(
            dimension_semantics=("parallel",)),
    )(frames2d, cw, sw, fbank, dct)


# ---------------------------------------------------------------------------
# JAX glue: pre-emphasis, framing (torch.stft center=True, constant pad),
# deltas, permute, crop / pad to feat_len.
# ---------------------------------------------------------------------------
def _frame_signal(x, fs, fn, with_emphasis):
    if with_emphasis:
        x = jnp.concatenate([x[:, :1], x[:, 1:] - 0.97 * x[:, :-1]], axis=1)
    pad = fn // 2
    xp = jnp.pad(x, ((0, 0), (pad, pad)))                          # 'constant'
    n_frames = 1 + (xp.shape[1] - fn) // fs
    idx = jnp.arange(n_frames)[:, None] * fs + jnp.arange(fn)[None, :]
    frames = xp[:, idx]                                            # (B, T, fn)
    return frames, int(n_frames)


def _delta(x):
    # (B, T, D): replicate-pad along T, out[t] = x[t+1] - x[t-1]
    xp = jnp.concatenate([x[:, :1], x, x[:, -1:]], axis=1)
    return xp[:, 2:] - xp[:, :-2]


def lfcc_forward(x, *, fl, fs, fn, sr, filter_num, feat_len,
                 pading='repeat', with_energy=False, with_emphasis=True,
                 with_delta=True, flag_for_LFB=False, row_tile=256):
    """x: (batch, length) waveform -> (batch, 1, dims, feat_len)."""
    assert x.ndim == 2
    if with_energy:
        # TODO(synk): with_energy=True (replace cepstral dim 0 by log frame
        # energy) needs the raw power-spectrum row sums; not wired up here.
        raise NotImplementedError("with_energy=True is not implemented")

    B = x.shape[0]
    x = x.astype(jnp.float32)

    frames, n_frames = _frame_signal(x, fs, fn, with_emphasis)
    (cw, sw, fbank, dct), dims = _build_padded_constants(
        fl, fn, sr, filter_num, flag_for_LFB)
    fn_p, f_p = dims['fn_p'], dims['f_p']

    # Pack batch & frames into one lane-dense 2-D row matrix for the kernel.
    t_pad = _round_up(n_frames, 8)
    frames = jnp.pad(frames, ((0, 0), (0, t_pad - n_frames), (0, fn_p - fn)))
    frames2d = frames.reshape(B * t_pad, fn_p)
    rows = B * t_pad
    rt = min(row_tile, rows)
    rows_pad = _round_up(rows, rt)
    frames2d = jnp.pad(frames2d, ((0, rows_pad - rows), (0, 0)))

    out2d = _lfcc_pallas(frames2d, jnp.asarray(cw), jnp.asarray(sw),
                         jnp.asarray(fbank), jnp.asarray(dct), rt)

    lfcc = out2d[:rows].reshape(B, t_pad, f_p)[:, :n_frames, :filter_num]

    if with_delta:
        d1 = _delta(lfcc)
        d2 = _delta(d1)
        out = jnp.concatenate([lfcc, d1, d2], axis=2)
    else:
        out = lfcc
    out = jnp.transpose(out, (0, 2, 1))                 # (B, dims, frames)

    this_feat_len = out.shape[2]
    if this_feat_len > feat_len:
        # host-side random crop, as in the reference module (not jit-safe)
        startp = int(np.random.randint(this_feat_len - feat_len))
        out = out[:, :, startp:startp + feat_len]
    elif this_feat_len < feat_len:
        if pading == 'zero':
            out = jnp.pad(out, ((0, 0), (0, 0), (0, feat_len - this_feat_len)))
        elif pading == 'repeat':
            # bug-compatible with repeat_padding: mul uses the CHANNEL dim
            mul = int(np.ceil(feat_len / out.shape[1]))
            out = jnp.tile(out, (1, 1, mul))[:, :, :feat_len]
        else:
            raise ValueError('Padding should be zero or repeat!')

    return out[:, None, :, :].astype(jnp.float32)       # unsqueeze(1)


# ---------------------------------------------------------------------------
# Pure-numpy (float64, np.fft) reference for correctness checking
# ---------------------------------------------------------------------------
def _lfcc_frames_ref(x, fl, fs, fn, sr, filter_num, with_emphasis=True,
                     flag_for_LFB=False):
    x = np.asarray(x, np.float64)
    if with_emphasis:
        x = np.concatenate([x[:, :1], x[:, 1:] - 0.97 * x[:, :-1]], axis=1)
    pad = fn // 2
    xp = np.pad(x, ((0, 0), (pad, pad)))
    T = 1 + (xp.shape[1] - fn) // fs
    idx = np.arange(T)[:, None] * fs + np.arange(fn)[None, :]
    frames = xp[:, idx]
    wp = _hamming_padded(fl, fn)
    spec = np.fft.rfft(frames * wp, n=fn, axis=-1)
    power = np.abs(spec) ** 2
    fb = np.log10(power @ _filter_bank(fn, sr, filter_num) + _F32_EPS)
    return fb if flag_for_LFB else fb @ _dct_matrix(filter_num)


def _forward_ref_np(x, *, fl, fs, fn, sr, filter_num, feat_len,
                    pading='repeat'):
    lfcc = _lfcc_frames_ref(x, fl, fs, fn, sr, filter_num)

    def delta_np(a):
        ap = np.concatenate([a[:, :1], a, a[:, -1:]], axis=1)
        return ap[:, 2:] - ap[:, :-2]

    d1 = delta_np(lfcc)
    d2 = delta_np(d1)
    out = np.concatenate([lfcc, d1, d2], axis=2).transpose(0, 2, 1)
    this_feat_len = out.shape[2]
    if this_feat_len < feat_len:
        if pading == 'repeat':
            mul = int(np.ceil(feat_len / out.shape[1]))
            out = np.tile(out, (1, 1, mul))[:, :, :feat_len]
        else:
            out = np.pad(out, ((0, 0), (0, 0), (0, feat_len - this_feat_len)))
    elif this_feat_len > feat_len:
        raise AssertionError("test shapes are expected to hit the pad path")
    return out[:, None, :, :].astype(np.float32)


# ---------------------------------------------------------------------------
if __name__ == "__main__":
    B = 2
    sr = 16000
    fl, frame_shift, fn = 64, 32, 64        # frame length / shift / FFT points
    filter_num = 20
    feat_len = 120
    n_samples = 2048

    key = jax.random.PRNGKey(0)
    x = jax.random.normal(key, (B, n_samples), dtype=jnp.float32)

    out = lfcc_forward(x, fl=fl, fs=frame_shift, fn=fn, sr=sr,
                       filter_num=filter_num, feat_len=feat_len)
    out = jax.block_until_ready(out)
    assert out.shape == (B, 1, 3 * filter_num, feat_len), out.shape
    out_np = np.asarray(out)
    assert np.all(np.isfinite(out_np))

    # Numerical check against a float64 numpy/np.fft reference.  Tolerance is
    # loose enough to cover reduced-precision MXU accumulation passes while
    # still catching any structural error (framing, window, FB, DCT).
    ref = _forward_ref_np(np.asarray(x), fl=fl, fs=frame_shift, fn=fn, sr=sr,
                          filter_num=filter_num, feat_len=feat_len)
    np.testing.assert_allclose(out_np, ref, rtol=3e-2, atol=3e-2)

    print("KERNEL_OK")
</pallas_src>

<mosaic_0001>
module attributes {stable_mosaic.version = 11 : i64} {
  func.func @_lfcc_kernel(%arg0: i32, %arg1: memref<144x128xf32, #tpu.memory_space<vmem>>, %arg2: memref<128x128xf32, #tpu.memory_space<vmem>>, %arg3: memref<128x128xf32, #tpu.memory_space<vmem>>, %arg4: memref<128x128xf32, #tpu.memory_space<vmem>>, %arg5: memref<128x128xf32, #tpu.memory_space<vmem>>, %arg6: memref<144x128xf32, #tpu.memory_space<vmem>>) attributes {dimension_semantics = [#tpu.dimension_semantics<parallel>], iteration_bounds = array<i64: 1>, scalar_prefetch = 0 : i64, scratch_operands = 0 : i64, tpu.core_type = #tpu.core_type<tc>, window_params = [{transform_indices = @transform_0, window_bounds = array<i64: 144, 128>}, {pipeline_mode = #tpu.pipeline_mode<synchronous>, transform_indices = @transform_1, window_bounds = array<i64: 128, 128>}, {pipeline_mode = #tpu.pipeline_mode<synchronous>, transform_indices = @transform_2, window_bounds = array<i64: 128, 128>}, {pipeline_mode = #tpu.pipeline_mode<synchronous>, transform_indices = @transform_3, window_bounds = array<i64: 128, 128>}, {pipeline_mode = #tpu.pipeline_mode<synchronous>, transform_indices = @transform_4, window_bounds = array<i64: 128, 128>}, {transform_indices = @transform_5, window_bounds = array<i64: 144, 128>}]} {
    %c0 = arith.constant 0 : index
    %c0_0 = arith.constant 0 : index
    %0 = vector.load %arg1[%c0, %c0_0] : memref<144x128xf32, #tpu.memory_space<vmem>>, vector<144x128xf32>
    %c0_1 = arith.constant 0 : index
    %c0_2 = arith.constant 0 : index
    %1 = vector.load %arg2[%c0_1, %c0_2] : memref<128x128xf32, #tpu.memory_space<vmem>>, vector<128x128xf32>
    %cst = arith.constant dense<0.000000e+00> : vector<144x128xf32>
    %2 = tpu.matmul %0, %1, %cst {dimension_numbers = #tpu.dot_dimension_numbers<[1], [0], [0], [1], [0, 0, 1, 1], [], []>} : vector<144x128xf32>, vector<128x128xf32>, vector<144x128xf32> -> vector<144x128xf32>
    %c0_3 = arith.constant 0 : index
    %c0_4 = arith.constant 0 : index
    %3 = vector.load %arg3[%c0_3, %c0_4] : memref<128x128xf32, #tpu.memory_space<vmem>>, vector<128x128xf32>
    %cst_5 = arith.constant dense<0.000000e+00> : vector<144x128xf32>
    %4 = tpu.matmul %0, %3, %cst_5 {dimension_numbers = #tpu.dot_dimension_numbers<[1], [0], [0], [1], [0, 0, 1, 1], [], []>} : vector<144x128xf32>, vector<128x128xf32>, vector<144x128xf32> -> vector<144x128xf32>
    %5 = arith.mulf %2, %2 : vector<144x128xf32>
    %6 = arith.mulf %4, %4 : vector<144x128xf32>
    %7 = arith.addf %5, %6 : vector<144x128xf32>
    %c0_6 = arith.constant 0 : index
    %c0_7 = arith.constant 0 : index
    %8 = vector.load %arg4[%c0_6, %c0_7] : memref<128x128xf32, #tpu.memory_space<vmem>>, vector<128x128xf32>
    %cst_8 = arith.constant dense<0.000000e+00> : vector<144x128xf32>
    %9 = tpu.matmul %7, %8, %cst_8 {dimension_numbers = #tpu.dot_dimension_numbers<[1], [0], [0], [1], [0, 0, 1, 1], [], []>} : vector<144x128xf32>, vector<128x128xf32>, vector<144x128xf32> -> vector<144x128xf32>
    %cst_9 = arith.constant 1.1920929E-7 : f32
    %10 = vector.broadcast %cst_9 : f32 to vector<144x128xf32>
    %11 = arith.addf %9, %10 : vector<144x128xf32>
    %12 = math.log %11 : vector<144x128xf32>
    %cst_10 = arith.constant 0.434294492 : f32
    %13 = vector.broadcast %cst_10 : f32 to vector<144x128xf32>
    %14 = arith.mulf %12, %13 : vector<144x128xf32>
    %c0_11 = arith.constant 0 : index
    %c0_12 = arith.constant 0 : index
    %15 = vector.load %arg5[%c0_11, %c0_12] : memref<128x128xf32, #tpu.memory_space<vmem>>, vector<128x128xf32>
    %cst_13 = arith.constant dense<0.000000e+00> : vector<144x128xf32>
    %16 = tpu.matmul %14, %15, %cst_13 {dimension_numbers = #tpu.dot_dimension_numbers<[1], [0], [0], [1], [0, 0, 1, 1], [], []>} : vector<144x128xf32>, vector<128x128xf32>, vector<144x128xf32> -> vector<144x128xf32>
    %c0_14 = arith.constant 0 : index
    %c0_15 = arith.constant 0 : index
    %17 = vector.load %arg6[%c0_14, %c0_15] : memref<144x128xf32, #tpu.memory_space<vmem>>, vector<144x128xf32>
    tpu.vector_store %arg6[%c0_14, %c0_15], %16 {strides = array<i32>} : memref<144x128xf32, #tpu.memory_space<vmem>>, vector<144x128xf32>,
    return
  }
  func.func @transform_0(%arg0: i32) -> (i32, i32) {
    %c0_i32 = arith.constant 0 : i32
    %c0_i32_0 = arith.constant 0 : i32
    return %arg0, %c0_i32 : i32, i32
  }
  func.func @transform_1(%arg0: i32) -> (i32, i32) {
    %c0_i32 = arith.constant 0 : i32
    %c0_i32_0 = arith.constant 0 : i32
    %c0_i32_1 = arith.constant 0 : i32
    return %c0_i32, %c0_i32_0 : i32, i32
  }
  func.func @transform_2(%arg0: i32) -> (i32, i32) {
    %c0_i32 = arith.constant 0 : i32
    %c0_i32_0 = arith.constant 0 : i32
    %c0_i32_1 = arith.constant 0 : i32
    return %c0_i32, %c0_i32_0 : i32, i32
  }
  func.func @transform_3(%arg0: i32) -> (i32, i32) {
    %c0_i32 = arith.constant 0 : i32
    %c0_i32_0 = arith.constant 0 : i32
    %c0_i32_1 = arith.constant 0 : i32
    return %c0_i32, %c0_i32_0 : i32, i32
  }
  func.func @transform_4(%arg0: i32) -> (i32, i32) {
    %c0_i32 = arith.constant 0 : i32
    %c0_i32_0 = arith.constant 0 : i32
    %c0_i32_1 = arith.constant 0 : i32
    return %c0_i32, %c0_i32_0 : i32, i32
  }
  func.func @transform_5(%arg0: i32) -> (i32, i32) {
    %c0_i32 = arith.constant 0 : i32
    %c0_i32_0 = arith.constant 0 : i32
    return %arg0, %c0_i32 : i32, i32
  }
}

</mosaic_0001>

<bundles_post_ra>
// kernel: tpu_custom_call.1
= control target key start
LH: loop header
LB: loop body
LE: loop exit
PB: predicated region body
PF: predicated region fallthrough
CT: control target
= control target key end

     0   :  { %10 = vsyncpa [#allocation3], 0  ;;  %s1762_s0 = inlined_call_operand.hbm [shape: f32[144,128], index: 0, kind: input, shape index: {}]   ;;  %s1763_s1 = inlined_call_operand.hbm [shape: f32[128,128], index: 1, kind: input, shape index: {}]   ;;  %s1764_s2 = inlined_call_operand.hbm [shape: f32[128,128], index: 2, kind: input, shape index: {}]   ;;  %s1765_s3 = inlined_call_operand.hbm [shape: f32[128,128], index: 3, kind: input, shape index: {}]   ;;  %s1766_s4 = inlined_call_operand.hbm [shape: f32[128,128], index: 4, kind: input, shape index: {}]   ;;  %s1767_s5 = inlined_call_operand.hbm [shape: f32[144,128], index: 5, kind: output, shape index: {}]  }
   0x1   :  { %11 = vsyncpa [#allocation6], 0 }
   0x2   :  { %12 = vsyncpa [#allocation9], 0 }
   0x3   :  { %13 = vsyncpa [#allocation4], 0  ;;  %s1620_s18 = smov [#allocation5]   ;;  %s1621_s20 = smov [#allocation8]  }
   0x4   :  { %s31_s19 = sshll.u32 %s1620_s18, 4  ;;  %s55_s21 = sshll.u32 %s1621_s20, 4  ;;  %s32_s19 = int_to_ptr.vmem [resolvable:$true] %s31_s19  ;;  %s1658_s21 = int_to_ptr.vmem [resolvable:$true] %s55_s21 }
   0x5   :  { %s1480_s24 = scalar_lea.hbm %s1763_s1, 2048 }
   0x6   :  { %p1481_p0 = scmp.ne.s32.totalorder %s1763_s1, %s1480_s24  ;;  %p1484_p1 = scmp.lt.u32.totalorder %s1480_s24, %s1763_s1 }
   0x8   :  { %p1486_p2 = pnand %p1484_p1, %p1481_p0 }
   0xa   :  { %1489 = shalt.err (!%p1486_p2)
}
   0xb   :  { %s1490_s29 = scalar_lea.vmem %s32_s19, 2048  ;;  %p1495_p4 = scmp.lt.s32.totalorder %s32_s19, %s32_s19 }
   0xc   :  { %p1491_p3 = scmp.ne.s32.totalorder %s32_s19, %s1490_s29  ;;  %p1496_p5 = scmp.lt.s32.totalorder %s1490_s29, %s1490_s29 }
   0xe   :  { %p1497_p6 = por %p1496_p5, %p1495_p4 }
  0x10   :  { %p1498_p7 = pnand %p1497_p6, %p1491_p3 }
  0x12   :  { %1501 = shalt.err (!%p1498_p7)
}
  0x13   :  { %s1622_s30 = smov 128   ;;  %s1623_s6 = smov 8  }
  0x14   :  { %37 = dma.hbm_to_vmem [thread:$0]  %s1763_s1, 2048, %s32_s19, [#allocation6], %s1622_s30, %s1622_s30, %s1623_s6  }
  0x15   :  { %s1502_s11 = scalar_lea.hbm %s1765_s3, 2048 }
  0x16   :  { %p1503_p8 = scmp.ne.s32.totalorder %s1765_s3, %s1502_s11  ;;  %p1506_p9 = scmp.lt.u32.totalorder %s1502_s11, %s1765_s3 }
  0x18   :  { %p1508_p10 = pnand %p1506_p9, %p1503_p8 }
  0x1a   :  { %1511 = shalt.err (!%p1508_p10)
}
  0x1b   :  { %s1512_s16 = scalar_lea.vmem %s1658_s21, 2048  ;;  %p1517_p12 = scmp.lt.s32.totalorder %s1658_s21, %s1658_s21 }
  0x1c   :  { %p1513_p11 = scmp.ne.s32.totalorder %s1658_s21, %s1512_s16  ;;  %p1518_p13 = scmp.lt.s32.totalorder %s1512_s16, %s1512_s16 }
  0x1e   :  { %p1519_p0 = por %p1518_p13, %p1517_p12 }
  0x20   :  { %p1520_p1 = pnand %p1519_p0, %p1513_p11 }
  0x22   :  { %1523 = shalt.err (!%p1520_p1)
}
  0x23   :  { %61 = dma.hbm_to_vmem [thread:$0]  %s1765_s3, 2048, %s1658_s21, [#allocation9], %s1622_s30, %s1622_s30, %s1623_s6  }
  0x24   :  { %s1624_s18 = smov [#allocation2]   ;;  %s1625_s20 = smov [#allocation7]  }
  0x25   :  { %s19_s19 = sshll.u32 %s1624_s18, 4  ;;  %s43_s22 = sshll.u32 %s1625_s20, 4  ;;  %s20_s19 = int_to_ptr.vmem [resolvable:$true] %s19_s19  ;;  %s1695_s22 = int_to_ptr.vmem [resolvable:$true] %s43_s22 }
  0x26   :  { %s1524_s25 = scalar_lea.hbm %s1762_s0, 2304 }
  0x27   :  { %p1525_p2 = scmp.ne.s32.totalorder %s1762_s0, %s1524_s25  ;;  %p1528_p3 = scmp.lt.u32.totalorder %s1524_s25, %s1762_s0 }
  0x29   :  { %p1530_p4 = pnand %p1528_p3, %p1525_p2 }
  0x2b   :  { %1533 = shalt.err (!%p1530_p4)
}
  0x2c   :  { %s1534_s3 = scalar_lea.vmem %s20_s19, 2304  ;;  %p1539_p6 = scmp.lt.s32.totalorder %s20_s19, %s20_s19 }
  0x2d   :  { %p1535_p5 = scmp.ne.s32.totalorder %s20_s19, %s1534_s3  ;;  %p1540_p7 = scmp.lt.s32.totalorder %s1534_s3, %s1534_s3 }
  0x2f   :  { %p1541_p8 = por %p1540_p7, %p1539_p6 }
  0x31   :  { %p1542_p9 = pnand %p1541_p8, %p1535_p5 }
  0x33   :  { %1545 = shalt.err (!%p1542_p9)
}
  0x34   :  { %25 = dma.hbm_to_vmem [thread:$0]  %s1762_s0, 2304, %s20_s19, [#allocation3], %s1622_s30, %s1622_s30, %s1623_s6  }
  0x35   :  { %s1546_s10 = scalar_lea.hbm %s1764_s2, 2048 }
  0x36   :  { %p1547_p10 = scmp.ne.s32.totalorder %s1764_s2, %s1546_s10  ;;  %p1550_p11 = scmp.lt.u32.totalorder %s1546_s10, %s1764_s2 }
  0x38   :  { %p1552_p12 = pnand %p1550_p11, %p1547_p10 }
  0x3a   :  { %1555 = shalt.err (!%p1552_p12)
}
  0x3b   :  { %s1556_s15 = scalar_lea.vmem %s1695_s22, 2048  ;;  %p1561_p0 = scmp.lt.s32.totalorder %s1695_s22, %s1695_s22 }
  0x3c   :  { %p1557_p13 = scmp.ne.s32.totalorder %s1695_s22, %s1556_s15  ;;  %p1562_p1 = scmp.lt.s32.totalorder %s1556_s15, %s1556_s15 }
  0x3e   :  { %p1563_p2 = por %p1562_p1, %p1561_p0 }
  0x40   :  { %p1564_p3 = pnand %p1563_p2, %p1557_p13 }
  0x42   :  { %1567 = shalt.err (!%p1564_p3)
}
  0x43   :  { %49 = dma.hbm_to_vmem [thread:$0]  %s1764_s2, 2048, %s1695_s22, [#allocation6], %s1622_s30, %s1622_s30, %s1623_s6  }
  0x44   :  { %s1626_s1 = smov [#allocation10]   ;;  %s1568_s20 = scalar_lea.hbm %s1766_s4, 2048 }
  0x45   :  { %s67_s17 = sshll.u32 %s1626_s1, 4  ;;  %p1569_p4 = scmp.ne.s32.totalorder %s1766_s4, %s1568_s20  ;;  %s68_s17 = int_to_ptr.vmem [resolvable:$true] %s67_s17 }
  0x46   :  { %p1572_p5 = scmp.lt.u32.totalorder %s1568_s20, %s1766_s4 }
  0x48   :  { %p1574_p6 = pnand %p1572_p5, %p1569_p4 }
  0x4a   :  { %1577 = shalt.err (!%p1574_p6)
}
  0x4b   :  { %s1578_s27 = scalar_lea.vmem %s68_s17, 2048  ;;  %p1583_p8 = scmp.lt.s32.totalorder %s68_s17, %s68_s17 }
  0x4c   :  { %p1579_p7 = scmp.ne.s32.totalorder %s68_s17, %s1578_s27  ;;  %p1584_p9 = scmp.lt.s32.totalorder %s1578_s27, %s1578_s27 }
  0x4e   :  { %p1585_p10 = por %p1584_p9, %p1583_p8 }
  0x50   :  { %p1586_p11 = pnand %p1585_p10, %p1579_p7 }
  0x52   :  { %1589 = shalt.err (!%p1586_p11)
}
  0x53   :  { %73 = dma.hbm_to_vmem [thread:$0]  %s1766_s4, 2048, %s68_s17, [#allocation9], %s1622_s30, %s1622_s30, %s1623_s6  }
  0x54   :  { %1612 = dma.done.wait [#allocation3], 2304  }
  0x55   :  { %1613 = vsyncadd [#allocation3], 4294964992 }
  0x56   :  { %1614 = dma.done.wait [#allocation6], 4096  }
  0x57   :  { %1615 = vsyncadd [#allocation6], 4294963200 }
  0x58   :  { %1616 = dma.done.wait [#allocation9], 4096  }
  0x59   :  { %1617 = vsyncadd [#allocation9], 4294963200  ;;  %v107_v0 = vld [vmem:[#allocation5] sm:$0xff]  ;;  %v108_v1 = vld [vmem:[#allocation5 + $0x8] sm:$0xff]  ;;  %s1627_s4 = smov [#allocation11]  }
  0x5a   :  { %v278_v2 = vld [vmem:[#allocation7] sm:$0xff]  ;;  %v1308_v3 = vpack.c.bf16 %v108_v1, %v107_v0  ;;  %v279_v4 = vld [vmem:[#allocation7 + $0x8] sm:$0xff]  ;;  %v109_v5 = vld [vmem:[#allocation5 + $0x10] sm:$0xff]  ;;  %s922_s28 = sshll.u32 %s1627_s4, 4  ;;  %s923_s28 = int_to_ptr.vmem [resolvable:$true] %s922_s28 }
  0x5b   :  { %v110_v6 = vld [vmem:[#allocation5 + $0x18] sm:$0xff]  ;;  %v1340_v7 = vpack.c.bf16 %v279_v4, %v278_v2  ;;  %v280_v9 = vld [vmem:[#allocation7 + $0x10] sm:$0xff]  ;;  %v111_v11 = vld [vmem:[#allocation5 + $0x20] sm:$0xff]  ;;  %s1590_s29 = scalar_lea.vmem %s923_s28, 2304  ;;  %p1595_p13 = scmp.lt.s32.totalorder %s923_s28, %s923_s28 }
  0x5c   :  { %v1312_v8 = vpack.c.bf16 %v110_v6, %v109_v5  ;;  %v281_v10 = vld [vmem:[#allocation7 + $0x18] sm:$0xff]  ;;  %1309 = vmatprep.subr.bf16.mxu0 %v1308_v3  ;;  %v112_v13 = vld [vmem:[#allocation5 + $0x28] sm:$0xff]  ;;  %v282_v14 = vld [vmem:[#allocation7 + $0x20] sm:$0xff]  ;;  %p1591_p12 = scmp.ne.s32.totalorder %s923_s28, %s1590_s29  ;;  %p1596_p0 = scmp.lt.s32.totalorder %s1590_s29, %s1590_s29 }
  0x5d   :  { %v1344_v12 = vpack.c.bf16 %v281_v10, %v280_v9  ;;  %v283_v15 = vld [vmem:[#allocation7 + $0x28] sm:$0xff]  ;;  %1341 = vmatprep.subr.bf16.mxu1 %v1340_v7  ;;  %1311 = vmatpush3.bf16.msra.mxu0 %v1308_v3  ;;  %v1316_v16 = vpack.c.bf16 %v112_v13, %v111_v11  ;;  %v113_v18 = vld [vmem:[#allocation5 + $0x30] sm:$0xff]  ;;  %v114_v19 = vld [vmem:[#allocation5 + $0x38] sm:$0xff] }
  0x5e   :  { %1343 = vmatpush3.bf16.msra.mxu1 %v1340_v7  ;;  %1313 = vmatprep.subr.bf16.mxu0 %v1312_v8  ;;  %v1348_v17 = vpack.c.bf16 %v283_v15, %v282_v14  ;;  %v284_v20 = vld [vmem:[#allocation7 + $0x30] sm:$0xff]  ;;  %v285_v21 = vld [vmem:[#allocation7 + $0x38] sm:$0xff]  ;;  %v1320_v22 = vpack.c.bf16 %v114_v19, %v113_v18  ;;  %v115_v24 = vld [vmem:[#allocation5 + $0x40] sm:$0xff]  ;;  %p1597_p1 = por %p1596_p0, %p1595_p13 }
  0x5f   :  { %1345 = vmatprep.subr.bf16.mxu1 %v1344_v12  ;;  %v1352_v23 = vpack.c.bf16 %v285_v21, %v284_v20  ;;  %v116_v25 = vld [vmem:[#allocation5 + $0x48] sm:$0xff]  ;;  %v89_v26 = vld [vmem:[#allocation2] sm:$0xff]  ;;  %v286_v27 = vld [vmem:[#allocation7 + $0x40] sm:$0xff] }
  0x60   :  { %v287_v28 = vld [vmem:[#allocation7 + $0x48] sm:$0xff]  ;;  %1104 = vmatprep.mubr.f32.mxu0 %v89_v26  ;;  %1163 = vmatprep.mubr.f32.mxu1 %v89_v26  ;;  %v1324_v29 = vpack.c.bf16 %v116_v25, %v115_v24  ;;  %v117_v31 = vld [vmem:[#allocation5 + $0x50] sm:$0xff]  ;;  %v118_v32 = vld [vmem:[#allocation5 + $0x58] sm:$0xff]  ;;  %p1598_p2 = pnand %p1597_p1, %p1591_p12 }
  0x61   :  { %1315 = vmatpush3.bf16.msra.mxu0 %v1312_v8  ;;  %v1356_v30 = vpack.c.bf16 %v287_v28, %v286_v27  ;;  %v288_v33 = vld [vmem:[#allocation7 + $0x50] sm:$0xff]  ;;  %v289_v34 = vld [vmem:[#allocation7 + $0x58] sm:$0xff]  ;;  %v1328_v35 = vpack.c.bf16 %v118_v32, %v117_v31  ;;  %v119_v37 = vld [vmem:[#allocation5 + $0x60] sm:$0xff] }
  0x62   :  { %1347 = vmatpush3.bf16.msra.mxu1 %v1344_v12  ;;  %1317 = vmatprep.subr.bf16.mxu0 %v1316_v16  ;;  %v1360_v36 = vpack.c.bf16 %v289_v34, %v288_v33  ;;  %v120_v38 = vld [vmem:[#allocation5 + $0x68] sm:$0xff]  ;;  %v290_v39 = vld [vmem:[#allocation7 + $0x60] sm:$0xff]  ;;  %v121_v43 = vld [vmem:[#allocation5 + $0x70] sm:$0xff] }
  0x63   :  { %1349 = vmatprep.subr.bf16.mxu1 %v1348_v17  ;;  %v291_v40 = vld [vmem:[#allocation7 + $0x68] sm:$0xff]  ;;  %v1332_v41 = vpack.c.bf16 %v120_v38, %v119_v37  ;;  %v122_v44 = vld [vmem:[#allocation5 + $0x78] sm:$0xff]  ;;  %v292_v45 = vld [vmem:[#allocation7 + $0x70] sm:$0xff] }
  0x64   :  { %v1364_v42 = vpack.c.bf16 %v291_v40, %v290_v39  ;;  %v293_v46 = vld [vmem:[#allocation7 + $0x78] sm:$0xff]  ;;  %v1336_v47 = vpack.c.bf16 %v122_v44, %v121_v43  ;;  %v503_v49 = vld [vmem:[#allocation8] sm:$0xff]  ;;  %v504_v50 = vld [vmem:[#allocation8 + $0x8] sm:$0xff] }
  0x65   :  { %1319 = vmatpush3.bf16.msra.mxu0 %v1316_v16  ;;  %v1368_v48 = vpack.c.bf16 %v293_v46, %v292_v45  ;;  %v1372_v51 = vpack.c.bf16 %v504_v50, %v503_v49  ;;  %v505_v52 = vld [vmem:[#allocation8 + $0x10] sm:$0xff]  ;;  %v506_v53 = vld [vmem:[#allocation8 + $0x18] sm:$0xff]  ;;  %v91_v55 = vld [vmem:[#allocation2 + $0x10] sm:$0xff] }
  0x66   :  { %1351 = vmatpush3.bf16.msra.mxu1 %v1348_v17  ;;  %1321 = vmatprep.subr.bf16.mxu0 %v1320_v22  ;;  %v90_v54 = vld [vmem:[#allocation2 + $0x8] sm:$0xff]  ;;  %v1376_v56 = vpack.c.bf16 %v506_v53, %v505_v52  ;;  %v507_v57 = vld [vmem:[#allocation8 + $0x20] sm:$0xff]  ;;  %v508_v58 = vld [vmem:[#allocation8 + $0x28] sm:$0xff] }
  0x67   :  { %1353 = vmatprep.subr.bf16.mxu1 %v1352_v23  ;;  %v92_v59 = vld [vmem:[#allocation2 + $0x18] sm:$0xff]  ;;  %v93_v60 = vld [vmem:[#allocation2 + $0x20] sm:$0xff]  ;;  %v1380_v61 = vpack.c.bf16 %v508_v58, %v507_v57  ;;  %v510_v63 = vld [vmem:[#allocation8 + $0x38] sm:$0xff] }
  0x68   :  { %v509_v62 = vld [vmem:[#allocation8 + $0x30] sm:$0xff]  ;;  %v94_v0 = vld [vmem:[#allocation2 + $0x28] sm:$0xff]  ;;  %v95_v1 = vld [vmem:[#allocation2 + $0x30] sm:$0xff] }
  0x69   :  { %1323 = vmatpush3.bf16.msra.mxu0 %v1320_v22  ;;  %v1384_v2 = vpack.c.bf16 %v510_v63, %v509_v62  ;;  %v511_v3 = vld [vmem:[#allocation8 + $0x40] sm:$0xff]  ;;  %v512_v4 = vld [vmem:[#allocation8 + $0x48] sm:$0xff]  ;;  %v97_v6 = vld [vmem:[#allocation2 + $0x40] sm:$0xff] }
  0x6a   :  { %1355 = vmatpush3.bf16.msra.mxu1 %v1352_v23  ;;  %1325 = vmatprep.subr.bf16.mxu0 %v1324_v29  ;;  %v96_v5 = vld [vmem:[#allocation2 + $0x38] sm:$0xff]  ;;  %v1388_v7 = vpack.c.bf16 %v512_v4, %v511_v3  ;;  %v513_v8 = vld [vmem:[#allocation8 + $0x50] sm:$0xff]  ;;  %v514_v9 = vld [vmem:[#allocation8 + $0x58] sm:$0xff] }
  0x6b   :  { %1357 = vmatprep.subr.bf16.mxu1 %v1356_v30  ;;  %v98_v10 = vld [vmem:[#allocation2 + $0x48] sm:$0xff]  ;;  %v99_v11 = vld [vmem:[#allocation2 + $0x50] sm:$0xff]  ;;  %v1392_v12 = vpack.c.bf16 %v514_v9, %v513_v8  ;;  %v516_v14 = vld [vmem:[#allocation8 + $0x68] sm:$0xff] }
  0x6c   :  { %v515_v13 = vld [vmem:[#allocation8 + $0x60] sm:$0xff]  ;;  %v100_v15 = vld [vmem:[#allocation2 + $0x58] sm:$0xff]  ;;  %v101_v16 = vld [vmem:[#allocation2 + $0x60] sm:$0xff] }
  0x6d   :  { %1327 = vmatpush3.bf16.msra.mxu0 %v1324_v29  ;;  %v1396_v17 = vpack.c.bf16 %v516_v14, %v515_v13  ;;  %v102_v18 = vld [vmem:[#allocation2 + $0x68] sm:$0xff]  ;;  %v103_v19 = vld [vmem:[#allocation2 + $0x70] sm:$0xff]  ;;  %v104_v20 = vld [vmem:[#allocation2 + $0x78] sm:$0xff] }
  0x6e   :  { %1359 = vmatpush3.bf16.msra.mxu1 %v1356_v30  ;;  %1329 = vmatprep.subr.bf16.mxu0 %v1328_v35  ;;  %v105_v21 = vld [vmem:[#allocation2 + $0x80] sm:$0xff]  ;;  %v106_v22 = vld [vmem:[#allocation2 + $0x88] sm:$0xff]  ;;  %v728_v26 = vld [vmem:[#allocation10] sm:$0xff] }
  0x6f   :  { %1361 = vmatprep.subr.bf16.mxu1 %v1360_v36  ;;  %v517_v23 = vld [vmem:[#allocation8 + $0x70] sm:$0xff]  ;;  %v518_v24 = vld [vmem:[#allocation8 + $0x78] sm:$0xff]  ;;  %v729_v27 = vld [vmem:[#allocation10 + $0x8] sm:$0xff] }
  0x70   :  { %v1400_v25 = vpack.c.bf16 %v518_v24, %v517_v23  ;;  %v730_v28 = vld [vmem:[#allocation10 + $0x10] sm:$0xff]  ;;  %v1404_v29 = vpack.c.bf16 %v729_v27, %v728_v26  ;;  %v731_v30 = vld [vmem:[#allocation10 + $0x18] sm:$0xff]  ;;  %v732_v32 = vld [vmem:[#allocation10 + $0x20] sm:$0xff] }
  0x71   :  { %1331 = vmatpush3.bf16.msra.mxu0 %v1328_v35  ;;  %v1408_v31 = vpack.c.bf16 %v731_v30, %v730_v28  ;;  %v733_v33 = vld [vmem:[#allocation10 + $0x28] sm:$0xff]  ;;  %v734_v35 = vld [vmem:[#allocation10 + $0x30] sm:$0xff] }
  0x72   :  { %1363 = vmatpush3.bf16.msra.mxu1 %v1360_v36  ;;  %1333 = vmatprep.subr.bf16.mxu0 %v1332_v41  ;;  %v1412_v34 = vpack.c.bf16 %v733_v33, %v732_v32  ;;  %v735_v36 = vld [vmem:[#allocation10 + $0x38] sm:$0xff] }
  0x73   :  { %1365 = vmatprep.subr.bf16.mxu1 %v1364_v42  ;;  %v1416_v37 = vpack.c.bf16 %v735_v36, %v734_v35 }
  0x75   :  { %1335 = vmatpush3.bf16.msra.mxu0 %v1332_v41 }
  0x76   :  { %1367 = vmatpush3.bf16.msra.mxu1 %v1364_v42  ;;  %1337 = vmatprep.subr.bf16.mxu0 %v1336_v47 }
  0x77   :  { %1369 = vmatprep.subr.bf16.mxu1 %v1368_v48 }
  0x79   :  { %1339 = vmatpush3.bf16.msra.mxu0 %v1336_v47 }
  0x7a   :  { %1371 = vmatpush3.bf16.msra.mxu1 %v1368_v48  ;;  %1373 = vmatprep.subr.bf16.mxu0 %v1372_v51 }
  0x7b   :  { %1405 = vmatprep.subr.bf16.mxu1 %v1404_v29 }
  0x7c   :  { %1105 = vmatmul.mubr.f32.vlgmr.msra.gmra.mrb[0].mxu0 %v90_v54 }
  0x7d   :  { %1164 = vmatmul.mubr.f32.vlgmr.msra.gmra.mrb[0].mxu1 %v90_v54  ;;  %1107 = vmatprep.mubr.f32.mxu0 %v91_v55 }
  0x7e   :  { %1166 = vmatprep.mubr.f32.mxu1 %v91_v55  ;;  %1375 = vmatpush3.bf16.msra.mxu0 %v1372_v51 }
  0x7f   :  { %1377 = vmatprep.subr.bf16.mxu0 %v1376_v56  ;;  %1407 = vmatpush3.bf16.msra.mxu1 %v1404_v29 }
  0x80   :  { %1108 = vmatmul.mubr.f32.gmra.mrb[2].mxu0 %v92_v59  ;;  %1409 = vmatprep.subr.bf16.mxu1 %v1408_v31 }
  0x81   :  { %1167 = vmatmul.mubr.f32.gmra.mrb[2].mxu1 %v92_v59  ;;  %1110 = vmatprep.mubr.f32.mxu0 %v93_v60 }
  0x82   :  { %1169 = vmatprep.mubr.f32.mxu1 %v93_v60  ;;  %1379 = vmatpush3.bf16.msra.mxu0 %v1376_v56 }
  0x83   :  { %1381 = vmatprep.subr.bf16.mxu0 %v1380_v61  ;;  %1411 = vmatpush3.bf16.msra.mxu1 %v1408_v31 }
  0x84   :  { %1111 = vmatmul.mubr.f32.gmra.mrb[4].mxu0 %v94_v0  ;;  %1413 = vmatprep.subr.bf16.mxu1 %v1412_v34 }
  0x85   :  { %1170 = vmatmul.mubr.f32.gmra.mrb[4].mxu1 %v94_v0  ;;  %1113 = vmatprep.mubr.f32.mxu0 %v95_v1 }
  0x86   :  { %1172 = vmatprep.mubr.f32.mxu1 %v95_v1  ;;  %1383 = vmatpush3.bf16.msra.mxu0 %v1380_v61 }
  0x87   :  { %1385 = vmatprep.subr.bf16.mxu0 %v1384_v2  ;;  %1415 = vmatpush3.bf16.msra.mxu1 %v1412_v34 }
  0x88   :  { %1114 = vmatmul.mubr.f32.gmra.mrb[6].mxu0 %v96_v5  ;;  %1417 = vmatprep.subr.bf16.mxu1 %v1416_v37 }
  0x89   :  { %1173 = vmatmul.mubr.f32.gmra.mrb[6].mxu1 %v96_v5  ;;  %1116 = vmatprep.mubr.f32.mxu0 %v97_v6 }
  0x8a   :  { %1175 = vmatprep.mubr.f32.mxu1 %v97_v6  ;;  %1387 = vmatpush3.bf16.msra.mxu0 %v1384_v2 }
  0x8b   :  { %1389 = vmatprep.subr.bf16.mxu0 %v1388_v7  ;;  %1419 = vmatpush3.bf16.msra.mxu1 %v1416_v37 }
  0x8c   :  { %1117 = vmatmul.mubr.f32.gmra.mrb[8].mxu0 %v98_v10 }
  0x8d   :  { %1176 = vmatmul.mubr.f32.gmra.mrb[8].mxu1 %v98_v10  ;;  %1119 = vmatprep.mubr.f32.mxu0 %v99_v11 }
  0x8e   :  { %1178 = vmatprep.mubr.f32.mxu1 %v99_v11  ;;  %1391 = vmatpush3.bf16.msra.mxu0 %v1388_v7 }
  0x8f   :  { %1393 = vmatprep.subr.bf16.mxu0 %v1392_v12 }
  0x90   :  { %1120 = vmatmul.mubr.f32.gmra.mrb[10].mxu0 %v100_v15 }
  0x91   :  { %1179 = vmatmul.mubr.f32.gmra.mrb[10].mxu1 %v100_v15  ;;  %1122 = vmatprep.mubr.f32.mxu0 %v101_v16 }
  0x92   :  { %1181 = vmatprep.mubr.f32.mxu1 %v101_v16  ;;  %1395 = vmatpush3.bf16.msra.mxu0 %v1392_v12 }
  0x93   :  { %1397 = vmatprep.subr.bf16.mxu0 %v1396_v17 }
  0x94   :  { %1123 = vmatmul.mubr.f32.gmra.mrb[12].mxu0 %v102_v18 }
  0x95   :  { %1182 = vmatmul.mubr.f32.gmra.mrb[12].mxu1 %v102_v18  ;;  %1125 = vmatprep.mubr.f32.mxu0 %v103_v19 }
  0x96   :  { %1184 = vmatprep.mubr.f32.mxu1 %v103_v19  ;;  %1399 = vmatpush3.bf16.msra.mxu0 %v1396_v17 }
  0x97   :  { %1401 = vmatprep.subr.bf16.mxu0 %v1400_v25 }
  0x98   :  { %1126 = vmatmul.mubr.f32.gmra.mrb[14].mxu0 %v104_v20 }
  0x99   :  { %1185 = vmatmul.mubr.f32.gmra.mrb[14].mxu1 %v104_v20  ;;  %1128 = vmatprep.mubr.f32.mxu0 %v105_v21 }
  0x9a   :  { %1187 = vmatprep.mubr.f32.mxu1 %v105_v21  ;;  %1403 = vmatpush3.bf16.msra.mxu0 %v1400_v25 }
  0x9c   :  { %1129 = vmatmul.mubr.f32.gmra.mrb[16].mxu0 %v106_v22 }
  0x9d   :  { %1188 = vmatmul.mubr.f32.gmra.mrb[16].mxu1 %v106_v22 }
 0x14f   :  { %v1106_v38 = vpop.f32.mrb[0].mxu0 }
 0x150   :  { %v450_v39 = vmul.f32 %v1106_v38, %v1106_v38  ;;  %v1165_v40 = vpop.f32.mrb[0].mxu1  ;;  %v189_v41 = vpop.f32.mrb[1].mxu0 }
 0x151   :  { %v468_v42 = vmul.f32 %v1165_v40, %v1165_v40  ;;  %v449_v43 = vmul.f32 %v189_v41, %v189_v41  ;;  %v360_v44 = vpop.f32.mrb[1].mxu1 }
 0x152   :  { %v467_v45 = vmul.f32 %v360_v44, %v360_v44 }
 0x153   :  { %v486_v46 = vadd.f32 %v468_v42, %v450_v39  ;;  %v1109_v47 = vpop.f32.mrb[2].mxu0 }
 0x154   :  { %v485_v48 = vadd.f32 %v467_v45, %v449_v43  ;;  %v452_v49 = vmul.f32 %v1109_v47, %v1109_v47  ;;  %v1168_v50 = vpop.f32.mrb[2].mxu1  ;;  %v199_v51 = vpop.f32.mrb[3].mxu0 }
 0x155   :  { %v470_v52 = vmul.f32 %v1168_v50, %v1168_v50  ;;  %v451_v53 = vmul.f32 %v199_v51, %v199_v51  ;;  %v370_v54 = vpop.f32.mrb[3].mxu1 }
 0x156   :  { %v469_v55 = vmul.f32 %v370_v54, %v370_v54  ;;  %1222 = vmatprep.mubr.f32.mxu0 %v485_v48 }
 0x157   :  { %v488_v56 = vadd.f32 %v470_v52, %v452_v49  ;;  %1223 = vmatmul.mubr.f32.vlgmr.msra.gmra.mrb[18].mxu0 %v486_v46  ;;  %v1112_v57 = vpop.f32.mrb[4].mxu0 }
 0x158   :  { %v487_v58 = vadd.f32 %v469_v55, %v451_v53  ;;  %v454_v59 = vmul.f32 %v1112_v57, %v1112_v57  ;;  %v1171_v60 = vpop.f32.mrb[4].mxu1  ;;  %v209_v61 = vpop.f32.mrb[5].mxu0 }
 0x159   :  { %v472_v62 = vmul.f32 %v1171_v60, %v1171_v60  ;;  %v453_v63 = vmul.f32 %v209_v61, %v209_v61  ;;  %v380_v0 = vpop.f32.mrb[5].mxu1 }
 0x15a   :  { %v471_v1 = vmul.f32 %v380_v0, %v380_v0  ;;  %1225 = vmatprep.mubr.f32.mxu0 %v487_v58  ;;  %v736_v0 = vld [vmem:[#allocation10 + $0x40] sm:$0xff] }
 0x15b   :  { %v490_v2 = vadd.f32 %v472_v62, %v454_v59  ;;  %1226 = vmatmul.mubr.f32.gmra.mrb[20].mxu0 %v488_v56  ;;  %v1115_v3 = vpop.f32.mrb[6].mxu0 }
 0x15c   :  { %v489_v4 = vadd.f32 %v471_v1, %v453_v63  ;;  %v456_v5 = vmul.f32 %v1115_v3, %v1115_v3  ;;  %v1174_v6 = vpop.f32.mrb[6].mxu1  ;;  %v219_v7 = vpop.f32.mrb[7].mxu0  ;;  %v737_v1 = vld [vmem:[#allocation10 + $0x48] sm:$0xff]  ;;  %v738_v3 = vld [vmem:[#allocation10 + $0x50] sm:$0xff] }
 0x15d   :  { %v474_v8 = vmul.f32 %v1174_v6, %v1174_v6  ;;  %v455_v9 = vmul.f32 %v219_v7, %v219_v7  ;;  %v390_v10 = vpop.f32.mrb[7].mxu1  ;;  %v740_v6 = vld [vmem:[#allocation10 + $0x60] sm:$0xff]  ;;  %v741_v7 = vld [vmem:[#allocation10 + $0x68] sm:$0xff] }
 0x15e   :  { %v473_v11 = vmul.f32 %v390_v10, %v390_v10  ;;  %1228 = vmatprep.mubr.f32.mxu0 %v489_v4  ;;  %v739_v4 = vld [vmem:[#allocation10 + $0x58] sm:$0xff] }
 0x15f   :  { %v492_v12 = vadd.f32 %v474_v8, %v456_v5  ;;  %1229 = vmatmul.mubr.f32.gmra.mrb[22].mxu0 %v490_v2  ;;  %v1118_v13 = vpop.f32.mrb[8].mxu0  ;;  %v1420_v2 = vpack.c.bf16 %v737_v1, %v736_v0  ;;  %v1424_v5 = vpack.c.bf16 %v739_v4, %v738_v3  ;;  %v1428_v8 = vpack.c.bf16 %v741_v7, %v740_v6  ;;  %v743_v10 = vld [vmem:[#allocation10 + $0x78] sm:$0xff] }
 0x160   :  { %v491_v14 = vadd.f32 %v473_v11, %v455_v9  ;;  %v458_v15 = vmul.f32 %v1118_v13, %v1118_v13  ;;  %v1177_v16 = vpop.f32.mrb[8].mxu1  ;;  %v229_v17 = vpop.f32.mrb[9].mxu0  ;;  %v742_v9 = vld [vmem:[#allocation10 + $0x70] sm:$0xff] }
 0x161   :  { %v476_v18 = vmul.f32 %v1177_v16, %v1177_v16  ;;  %v457_v19 = vmul.f32 %v229_v17, %v229_v17  ;;  %v400_v20 = vpop.f32.mrb[9].mxu1  ;;  %1421 = vmatprep.subr.bf16.mxu1 %v1420_v2  ;;  %v1432_v11 = vpack.c.bf16 %v743_v10, %v742_v9 }
 0x162   :  { %v475_v21 = vmul.f32 %v400_v20, %v400_v20  ;;  %1231 = vmatprep.mubr.f32.mxu0 %v491_v14  ;;  %1423 = vmatpush3.bf16.msra.mxu1 %v1420_v2 }
 0x163   :  { %v494_v22 = vadd.f32 %v476_v18, %v458_v15  ;;  %1232 = vmatmul.mubr.f32.gmra.mrb[24].mxu0 %v492_v12  ;;  %v1121_v23 = vpop.f32.mrb[10].mxu0  ;;  %1425 = vmatprep.subr.bf16.mxu1 %v1424_v5 }
 0x164   :  { %v493_v24 = vadd.f32 %v475_v21, %v457_v19  ;;  %v460_v25 = vmul.f32 %v1121_v23, %v1121_v23  ;;  %v1180_v26 = vpop.f32.mrb[10].mxu1  ;;  %v239_v27 = vpop.f32.mrb[11].mxu0 }
 0x165   :  { %v478_v28 = vmul.f32 %v1180_v26, %v1180_v26  ;;  %v459_v29 = vmul.f32 %v239_v27, %v239_v27  ;;  %v410_v30 = vpop.f32.mrb[11].mxu1 }
 0x166   :  { %v477_v31 = vmul.f32 %v410_v30, %v410_v30  ;;  %1234 = vmatprep.mubr.f32.mxu0 %v493_v24  ;;  %1427 = vmatpush3.bf16.msra.mxu1 %v1424_v5 }
 0x167   :  { %v496_v32 = vadd.f32 %v478_v28, %v460_v25  ;;  %1235 = vmatmul.mubr.f32.gmra.mrb[26].mxu0 %v494_v22  ;;  %v1124_v33 = vpop.f32.mrb[12].mxu0  ;;  %1429 = vmatprep.subr.bf16.mxu1 %v1428_v8 }
 0x168   :  { %v495_v34 = vadd.f32 %v477_v31, %v459_v29  ;;  %v462_v35 = vmul.f32 %v1124_v33, %v1124_v33  ;;  %v1183_v36 = vpop.f32.mrb[12].mxu1  ;;  %v249_v37 = vpop.f32.mrb[13].mxu0 }
 0x169   :  { %v480_v38 = vmul.f32 %v1183_v36, %v1183_v36  ;;  %v461_v39 = vmul.f32 %v249_v37, %v249_v37  ;;  %v420_v40 = vpop.f32.mrb[13].mxu1 }
 0x16a   :  { %v479_v41 = vmul.f32 %v420_v40, %v420_v40  ;;  %1237 = vmatprep.mubr.f32.mxu0 %v495_v34  ;;  %1431 = vmatpush3.bf16.msra.mxu1 %v1428_v8 }
 0x16b   :  { %v498_v42 = vadd.f32 %v480_v38, %v462_v35  ;;  %1238 = vmatmul.mubr.f32.gmra.mrb[28].mxu0 %v496_v32  ;;  %v1127_v43 = vpop.f32.mrb[14].mxu0  ;;  %1433 = vmatprep.subr.bf16.mxu1 %v1432_v11 }
 0x16c   :  { %v497_v44 = vadd.f32 %v479_v41, %v461_v39  ;;  %v464_v45 = vmul.f32 %v1127_v43, %v1127_v43  ;;  %v1186_v46 = vpop.f32.mrb[14].mxu1  ;;  %v259_v47 = vpop.f32.mrb[15].mxu0 }
 0x16d   :  { %v482_v48 = vmul.f32 %v1186_v46, %v1186_v46  ;;  %v463_v49 = vmul.f32 %v259_v47, %v259_v47  ;;  %v430_v50 = vpop.f32.mrb[15].mxu1 }
 0x16e   :  { %v481_v51 = vmul.f32 %v430_v50, %v430_v50  ;;  %1240 = vmatprep.mubr.f32.mxu0 %v497_v44  ;;  %1435 = vmatpush3.bf16.msra.mxu1 %v1432_v11 }
 0x16f   :  { %v500_v52 = vadd.f32 %v482_v48, %v464_v45  ;;  %1241 = vmatmul.mubr.f32.gmra.mrb[30].mxu0 %v498_v42  ;;  %v1130_v53 = vpop.f32.mrb[16].mxu0 }
 0x170   :  { %v499_v54 = vadd.f32 %v481_v51, %v463_v49  ;;  %v466_v55 = vmul.f32 %v1130_v53, %v1130_v53  ;;  %v1189_v56 = vpop.f32.mrb[16].mxu1  ;;  %v269_v57 = vpop.f32.mrb[17].mxu0 }
 0x171   :  { %v484_v58 = vmul.f32 %v1189_v56, %v1189_v56  ;;  %v465_v59 = vmul.f32 %v269_v57, %v269_v57  ;;  %v440_v60 = vpop.f32.mrb[17].mxu1 }
 0x172   :  { %v483_v61 = vmul.f32 %v440_v60, %v440_v60  ;;  %1243 = vmatprep.mubr.f32.mxu0 %v499_v54 }
 0x173   :  { %v502_v62 = vadd.f32 %v484_v58, %v466_v55  ;;  %1244 = vmatmul.mubr.f32.gmra.mrb[32].mxu0 %v500_v52 }
 0x174   :  { %v501_v63 = vadd.f32 %v483_v61, %v465_v59 }
 0x176   :  { %1246 = vmatprep.mubr.f32.mxu0 %v501_v63 }
 0x177   :  { %1247 = vmatmul.mubr.f32.gmra.mrb[34].mxu0 %v502_v62 }
 0x22a   :  { %v1224_v12 = vpop.f32.mrb[18].mxu0 }
 0x22b   :  { %v591_v13 = vadd.f32 1.1920929e-07, %v1224_v12  ;;  %v585_v14 = vpop.f32.mrb[19].mxu0 }
 0x22c   :  { %v586_v15 = vadd.f32 1.1920929e-07, %v585_v14 }
 0x22d   :  { %1444 = vlog2.f32 %v591_v13 }
 0x22e   :  { %1446 = vlog2.f32 %v586_v15  ;;  %v1227_v16 = vpop.f32.mrb[20].mxu0 }
 0x22f   :  { %v601_v17 = vadd.f32 1.1920929e-07, %v1227_v16  ;;  %v595_v18 = vpop.f32.mrb[21].mxu0 }
 0x230   :  { %v596_v19 = vadd.f32 1.1920929e-07, %v595_v18 }
 0x231   :  { %1448 = vlog2.f32 %v601_v17 }
 0x232   :  { %1450 = vlog2.f32 %v596_v19  ;;  %v1230_v20 = vpop.f32.mrb[22].mxu0 }
 0x233   :  { %v611_v21 = vadd.f32 1.1920929e-07, %v1230_v20  ;;  %v605_v22 = vpop.f32.mrb[23].mxu0 }
 0x234   :  { %v606_v23 = vadd.f32 1.1920929e-07, %v605_v22 }
 0x235   :  { %1452 = vlog2.f32 %v611_v21 }
 0x236   :  { %1454 = vlog2.f32 %v606_v23  ;;  %v1233_v24 = vpop.f32.mrb[24].mxu0 }
 0x237   :  { %v1445_v25 = vpop.eup %1444  ;;  %v621_v26 = vadd.f32 1.1920929e-07, %v1233_v24  ;;  %v615_v27 = vpop.f32.mrb[25].mxu0 }
 0x238   :  { %v1447_v28 = vpop.eup %1446  ;;  %v677_v29 = vmul.f32 0.6931472, %v1445_v25  ;;  %v616_v30 = vadd.f32 1.1920929e-07, %v615_v27 }
 0x239   :  { %v675_v31 = vmul.f32 0.6931472, %v1447_v28  ;;  %1456 = vlog2.f32 %v621_v26 }
 0x23a   :  { %1458 = vlog2.f32 %v616_v30  ;;  %v1236_v32 = vpop.f32.mrb[26].mxu0  ;;  %v711_v38 = vmul.f32 0.4342945, %v677_v29 }
 0x23b   :  { %v1449_v33 = vpop.eup %1448  ;;  %v631_v34 = vadd.f32 1.1920929e-07, %v1236_v32  ;;  %v625_v35 = vpop.f32.mrb[27].mxu0  ;;  %v710_v36 = vmul.f32 0.4342945, %v675_v31 }
 0x23c   :  { %v1451_v37 = vpop.eup %1450  ;;  %v681_v39 = vmul.f32 0.6931472, %v1449_v33  ;;  %v626_v40 = vadd.f32 1.1920929e-07, %v625_v35 }
 0x23d   :  { %v679_v41 = vmul.f32 0.6931472, %v1451_v37  ;;  %1460 = vlog2.f32 %v631_v34  ;;  %1281 = vmatprep.mubr.f32.mxu1 %v710_v36 }
 0x23e   :  { %1462 = vlog2.f32 %v626_v40  ;;  %v1239_v42 = vpop.f32.mrb[28].mxu0  ;;  %1282 = vmatmul.mubr.f32.vlgmr.msra.gmra.mrb[18].mxu1 %v711_v38  ;;  %v713_v50 = vmul.f32 0.4342945, %v681_v39 }
 0x23f   :  { %v1453_v43 = vpop.eup %1452  ;;  %v641_v44 = vadd.f32 1.1920929e-07, %v1239_v42  ;;  %v635_v45 = vpop.f32.mrb[29].mxu0  ;;  %v712_v46 = vmul.f32 0.4342945, %v679_v41 }
 0x240   :  { %v1455_v47 = vpop.eup %1454  ;;  %v685_v48 = vmul.f32 0.6931472, %v1453_v43  ;;  %v636_v49 = vadd.f32 1.1920929e-07, %v635_v45 }
 0x241   :  { %v683_v51 = vmul.f32 0.6931472, %v1455_v47  ;;  %1464 = vlog2.f32 %v641_v44  ;;  %1284 = vmatprep.mubr.f32.mxu1 %v712_v46 }
 0x242   :  { %1466 = vlog2.f32 %v636_v49  ;;  %v1242_v52 = vpop.f32.mrb[30].mxu0  ;;  %1285 = vmatmul.mubr.f32.gmra.mrb[20].mxu1 %v713_v50  ;;  %v715_v60 = vmul.f32 0.4342945, %v685_v48 }
 0x243   :  { %v1457_v53 = vpop.eup %1456  ;;  %v651_v54 = vadd.f32 1.1920929e-07, %v1242_v52  ;;  %v645_v55 = vpop.f32.mrb[31].mxu0  ;;  %v714_v56 = vmul.f32 0.4342945, %v683_v51 }
 0x244   :  { %v1459_v57 = vpop.eup %1458  ;;  %v689_v58 = vmul.f32 0.6931472, %v1457_v53  ;;  %v646_v59 = vadd.f32 1.1920929e-07, %v645_v55 }
 0x245   :  { %v687_v61 = vmul.f32 0.6931472, %v1459_v57  ;;  %1468 = vlog2.f32 %v651_v54  ;;  %1287 = vmatprep.mubr.f32.mxu1 %v714_v56 }
 0x246   :  { %1470 = vlog2.f32 %v646_v59  ;;  %v1245_v62 = vpop.f32.mrb[32].mxu0  ;;  %1288 = vmatmul.mubr.f32.gmra.mrb[22].mxu1 %v715_v60  ;;  %v717_v6 = vmul.f32 0.4342945, %v689_v58 }
 0x247   :  { %v1461_v63 = vpop.eup %1460  ;;  %v661_v0 = vadd.f32 1.1920929e-07, %v1245_v62  ;;  %v655_v1 = vpop.f32.mrb[33].mxu0  ;;  %v716_v2 = vmul.f32 0.4342945, %v687_v61 }
 0x248   :  { %v1463_v3 = vpop.eup %1462  ;;  %v693_v4 = vmul.f32 0.6931472, %v1461_v63  ;;  %v656_v5 = vadd.f32 1.1920929e-07, %v655_v1 }
 0x249   :  { %v691_v7 = vmul.f32 0.6931472, %v1463_v3  ;;  %1472 = vlog2.f32 %v661_v0  ;;  %1290 = vmatprep.mubr.f32.mxu1 %v716_v2 }
 0x24a   :  { %1474 = vlog2.f32 %v656_v5  ;;  %v1248_v8 = vpop.f32.mrb[34].mxu0  ;;  %1291 = vmatmul.mubr.f32.gmra.mrb[24].mxu1 %v717_v6  ;;  %v719_v16 = vmul.f32 0.4342945, %v693_v4 }
 0x24b   :  { %v1465_v9 = vpop.eup %1464  ;;  %v671_v10 = vadd.f32 1.1920929e-07, %v1248_v8  ;;  %v665_v11 = vpop.f32.mrb[35].mxu0  ;;  %v718_v12 = vmul.f32 0.4342945, %v691_v7 }
 0x24c   :  { %v1467_v13 = vpop.eup %1466  ;;  %v697_v14 = vmul.f32 0.6931472, %v1465_v9  ;;  %v666_v15 = vadd.f32 1.1920929e-07, %v665_v11 }
 0x24d   :  { %v695_v17 = vmul.f32 0.6931472, %v1467_v13  ;;  %1476 = vlog2.f32 %v671_v10  ;;  %1293 = vmatprep.mubr.f32.mxu1 %v718_v12 }
 0x24e   :  { %1478 = vlog2.f32 %v666_v15  ;;  %1294 = vmatmul.mubr.f32.gmra.mrb[26].mxu1 %v719_v16  ;;  %v721_v22 = vmul.f32 0.4342945, %v697_v14 }
 0x24f   :  { %v1469_v18 = vpop.eup %1468  ;;  %v720_v19 = vmul.f32 0.4342945, %v695_v17 }
 0x250   :  { %v1471_v20 = vpop.eup %1470  ;;  %v701_v21 = vmul.f32 0.6931472, %v1469_v18 }
 0x251   :  { %v699_v23 = vmul.f32 0.6931472, %v1471_v20  ;;  %1296 = vmatprep.mubr.f32.mxu1 %v720_v19 }
 0x252   :  { %1297 = vmatmul.mubr.f32.gmra.mrb[28].mxu1 %v721_v22  ;;  %v723_v28 = vmul.f32 0.4342945, %v701_v21 }
 0x253   :  { %v1473_v24 = vpop.eup %1472  ;;  %v722_v25 = vmul.f32 0.4342945, %v699_v23 }
 0x254   :  { %v1475_v26 = vpop.eup %1474  ;;  %v705_v27 = vmul.f32 0.6931472, %v1473_v24 }
 0x255   :  { %v703_v29 = vmul.f32 0.6931472, %v1475_v26  ;;  %1299 = vmatprep.mubr.f32.mxu1 %v722_v25 }
 0x256   :  { %1300 = vmatmul.mubr.f32.gmra.mrb[30].mxu1 %v723_v28  ;;  %v725_v34 = vmul.f32 0.4342945, %v705_v27 }
 0x257   :  { %v1477_v30 = vpop.eup %1476  ;;  %v724_v31 = vmul.f32 0.4342945, %v703_v29 }
 0x258   :  { %v1479_v32 = vpop.eup %1478  ;;  %v709_v33 = vmul.f32 0.6931472, %v1477_v30 }
 0x259   :  { %v707_v35 = vmul.f32 0.6931472, %v1479_v32  ;;  %1302 = vmatprep.mubr.f32.mxu1 %v724_v31 }
 0x25a   :  { %1303 = vmatmul.mubr.f32.gmra.mrb[32].mxu1 %v725_v34  ;;  %v727_v37 = vmul.f32 0.4342945, %v709_v33 }
 0x25b   :  { %v726_v36 = vmul.f32 0.4342945, %v707_v35 }
 0x25d   :  { %1305 = vmatprep.mubr.f32.mxu1 %v726_v36 }
 0x25e   :  { %1306 = vmatmul.mubr.f32.gmra.mrb[34].mxu1 %v727_v37 }
 0x311   :  { %v1283_v38 = vpop.f32.mrb[18].mxu1 }
 0x312   :  { %900 = vst [vmem:[#allocation11 + $0x8] sm:$0xff] %v1283_v38  ;;  %v810_v39 = vpop.f32.mrb[19].mxu1 }
 0x313   :  { %899 = vst [vmem:[#allocation11] sm:$0xff] %v810_v39 }
 0x315   :  { %v1286_v40 = vpop.f32.mrb[20].mxu1 }
 0x316   :  { %902 = vst [vmem:[#allocation11 + $0x18] sm:$0xff] %v1286_v40  ;;  %v820_v41 = vpop.f32.mrb[21].mxu1 }
 0x317   :  { %901 = vst [vmem:[#allocation11 + $0x10] sm:$0xff] %v820_v41 }
 0x319   :  { %v1289_v42 = vpop.f32.mrb[22].mxu1 }
 0x31a   :  { %904 = vst [vmem:[#allocation11 + $0x28] sm:$0xff] %v1289_v42  ;;  %v830_v43 = vpop.f32.mrb[23].mxu1 }
 0x31b   :  { %903 = vst [vmem:[#allocation11 + $0x20] sm:$0xff] %v830_v43 }
 0x31d   :  { %v1292_v44 = vpop.f32.mrb[24].mxu1 }
 0x31e   :  { %906 = vst [vmem:[#allocation11 + $0x38] sm:$0xff] %v1292_v44  ;;  %v840_v45 = vpop.f32.mrb[25].mxu1 }
 0x31f   :  { %905 = vst [vmem:[#allocation11 + $0x30] sm:$0xff] %v840_v45 }
 0x321   :  { %v1295_v46 = vpop.f32.mrb[26].mxu1 }
 0x322   :  { %908 = vst [vmem:[#allocation11 + $0x48] sm:$0xff] %v1295_v46  ;;  %v850_v47 = vpop.f32.mrb[27].mxu1 }
 0x323   :  { %907 = vst [vmem:[#allocation11 + $0x40] sm:$0xff] %v850_v47 }
 0x325   :  { %v1298_v48 = vpop.f32.mrb[28].mxu1 }
 0x326   :  { %910 = vst [vmem:[#allocation11 + $0x58] sm:$0xff] %v1298_v48  ;;  %v860_v49 = vpop.f32.mrb[29].mxu1 }
 0x327   :  { %909 = vst [vmem:[#allocation11 + $0x50] sm:$0xff] %v860_v49 }
 0x329   :  { %v1301_v50 = vpop.f32.mrb[30].mxu1 }
 0x32a   :  { %912 = vst [vmem:[#allocation11 + $0x68] sm:$0xff] %v1301_v50  ;;  %v870_v51 = vpop.f32.mrb[31].mxu1 }
 0x32b   :  { %911 = vst [vmem:[#allocation11 + $0x60] sm:$0xff] %v870_v51 }
 0x32d   :  { %v1304_v52 = vpop.f32.mrb[32].mxu1 }
 0x32e   :  { %914 = vst [vmem:[#allocation11 + $0x78] sm:$0xff] %v1304_v52  ;;  %v880_v53 = vpop.f32.mrb[33].mxu1 }
 0x32f   :  { %913 = vst [vmem:[#allocation11 + $0x70] sm:$0xff] %v880_v53 }
 0x331   :  { %v1307_v54 = vpop.f32.mrb[34].mxu1 }
 0x332   :  { %916 = vst [vmem:[#allocation11 + $0x88] sm:$0xff] %v1307_v54  ;;  %v890_v55 = vpop.f32.mrb[35].mxu1 }
 0x333   :  { %915 = vst [vmem:[#allocation11 + $0x80] sm:$0xff] %v890_v55 }
 0x334   :  { %1601 = shalt.err (!%p1598_p2)
}
 0x335   :  { %s1602_s7 = scalar_lea.hbm %s1767_s5, 2304 }
 0x336   :  { %p1603_p3 = scmp.ne.s32.totalorder %s1767_s5, %s1602_s7  ;;  %p1606_p4 = scmp.lt.u32.totalorder %s1602_s7, %s1767_s5 }
 0x338   :  { %p1608_p5 = pnand %p1606_p4, %p1603_p3 }
 0x33a   :  { %1611 = shalt.err (!%p1608_p5)
}
 0x33b   :  { %928 = dma.vmem_to_hbm [thread:$0]  %s923_s28, 2304, %s1767_s5, [#allocation4], %s1622_s30, %s1622_s30, %s1623_s6  }
 0x33c   :  { %1618 = dma.done.wait [#allocation4], 2304  }
 0x33d   :  { %1619 = vsyncadd [#allocation4], 4294964992 }
 0x33e   :  { %932 = vsyncpa [#allocation3], 1 }
 0x33f   :  { %933 = vsyncpa [#allocation6], 1 }
 0x340   :  { %934 = vsyncpa [#allocation9], 1 }
 0x341   :  { %935 = vsyncpa [#allocation4], 1 }

</bundles_post_ra>
